<compile_context>
chip_gen: v7x
topology: tpu7x:2x2x1
jax: 0.10.0
libtpu: 0.0.40
codegen_flags: <defaults>
</compile_context>

<pallas_src>
import math
import functools

import jax
import jax.numpy as jnp
from jax import lax
from jax.experimental import pallas as pl
from jax.experimental.pallas import tpu as pltpu


# ----------------------------------------------------------------------------
# Fused self-attention kernel (one batch element per grid step)
# ----------------------------------------------------------------------------

def _self_attention_kernel(x_ref, wqkv_ref, bqkv_ref, wproj_ref, bproj_ref,
                           o_ref, *, n_head):
    """Fused SelfAttention forward for one batch element.

    x_ref     : (1, T, C)   activation tile
    wqkv_ref  : (C, 3C)     fused [query | key | value] weight (grid-resident)
    bqkv_ref  : (1, 3C)     fused bias
    wproj_ref : (C, C)      output projection weight (grid-resident)
    bproj_ref : (1, C)      output projection bias
    o_ref     : (1, T, C)   output tile
    """
    x = x_ref[0].astype(jnp.float32)                      # (T, C)
    T, C = x.shape
    hd = C // n_head
    scale = 1.0 / math.sqrt(hd)

    # Fused Q/K/V projection: one MXU matmul, lane-dense (3C) output.
    qkv = jnp.dot(x, wqkv_ref[...],
                  preferred_element_type=jnp.float32) + bqkv_ref[...]

    # Per-head attention with the output projection folded into the loop.
    # Static unroll over heads; everything stays in VMEM / vregs.
    acc = jnp.zeros((T, C), jnp.float32)
    for h in range(n_head):
        lo = h * hd
        q = qkv[:, lo:lo + hd]                            # (T, hd)
        k = qkv[:, C + lo:C + lo + hd]                    # (T, hd)
        v = qkv[:, 2 * C + lo:2 * C + lo + hd]            # (T, hd)

        # q @ k^T without materializing a transpose: contract last dims.
        s = lax.dot_general(q, k, (((1,), (1,)), ((), ())),
                            preferred_element_type=jnp.float32) * scale
        s = s - jnp.max(s, axis=-1, keepdims=True)
        p = jnp.exp(s)
        # Softmax denominator via EUP reciprocal instead of a VALU divide.
        p = p * pl.reciprocal(jnp.sum(p, axis=-1, keepdims=True), approx=True)
        # attn_drop = identity (eval semantics)
        yh = jnp.dot(p, v, preferred_element_type=jnp.float32)       # (T, hd)

        # Head-merge + output projection fused: y @ Wp == sum_h yh @ Wp[h*hd:]
        acc = acc + jnp.dot(yh, wproj_ref[lo:lo + hd, :],
                            preferred_element_type=jnp.float32)

    out = acc + bproj_ref[...]
    # resid_drop = identity (eval semantics)
    o_ref[0] = out.astype(o_ref.dtype)


def self_attention(x, params, n_head):
    """x: (B, T, C) -> (B, T, C). Fused QKV + attention + proj in one kernel."""
    B, T, C = x.shape
    assert C % n_head == 0
    hd = C // n_head

    # Fuse the three projection weights/biases (wrapper-side, weights only).
    wqkv = jnp.concatenate([params["q_w"], params["k_w"], params["v_w"]],
                           axis=1)                        # (C, 3C)
    bqkv = jnp.concatenate([params["q_b"], params["k_b"], params["v_b"]])

    # Advisory cost estimate for the XLA scheduler around the custom call.
    flops = (2 * B * T * C * (3 * C)            # QKV projection
             + 4 * B * n_head * T * T * hd      # q k^T  and  p v
             + 2 * B * T * C * C)               # output projection
    transcendentals = B * n_head * T * T        # exp
    bytes_accessed = 4 * (x.size + wqkv.size + bqkv.size
                          + params["proj_w"].size + params["proj_b"].size
                          + x.size)

    kernel = functools.partial(_self_attention_kernel, n_head=n_head)
    return pl.pallas_call(
        kernel,
        out_shape=jax.ShapeDtypeStruct((B, T, C), x.dtype),
        grid=(B,),
        in_specs=[
            pl.BlockSpec((1, T, C), lambda b: (b, 0, 0)),       # activations
            pl.BlockSpec((C, 3 * C), lambda b: (0, 0)),         # resident wqkv
            pl.BlockSpec((1, 3 * C), lambda b: (0, 0)),         # resident bqkv
            pl.BlockSpec((C, C), lambda b: (0, 0)),             # resident wproj
            pl.BlockSpec((1, C), lambda b: (0, 0)),             # resident bproj
        ],
        out_specs=pl.BlockSpec((1, T, C), lambda b: (b, 0, 0)),
        compiler_params=pltpu.CompilerParams(
            dimension_semantics=("parallel",),        # batch grid: TC-shardable
            vmem_limit_bytes=32 * 1024 * 1024,        # explicit; safe on v7x too
        ),
        cost_estimate=pl.CostEstimate(
            flops=flops,
            transcendentals=transcendentals,
            bytes_accessed=bytes_accessed,
        ),
    )(x, wqkv, bqkv.reshape(1, 3 * C),
      params["proj_w"], params["proj_b"].reshape(1, C))


# ----------------------------------------------------------------------------
# Pure-JAX reference (mirrors the PyTorch forward, dropout = identity)
# ----------------------------------------------------------------------------

def self_attention_reference(x, params, n_head):
    B, T, C = x.shape
    hd = C // n_head
    q = (x @ params["q_w"] + params["q_b"]).reshape(B, T, n_head, hd).transpose(0, 2, 1, 3)
    k = (x @ params["k_w"] + params["k_b"]).reshape(B, T, n_head, hd).transpose(0, 2, 1, 3)
    v = (x @ params["v_w"] + params["v_b"]).reshape(B, T, n_head, hd).transpose(0, 2, 1, 3)
    att = jnp.einsum("bhtd,bhsd->bhts", q, k) * (1.0 / math.sqrt(hd))
    att = jax.nn.softmax(att, axis=-1)
    y = jnp.einsum("bhts,bhsd->bhtd", att, v)
    y = y.transpose(0, 2, 1, 3).reshape(B, T, C)
    return y @ params["proj_w"] + params["proj_b"]


# ----------------------------------------------------------------------------

if __name__ == "__main__":
    # Small shapes consistent with the module; C=128 keeps every kernel output
    # lane-dense (last dim a multiple of 128), T=16 is sublane-aligned.
    B, T, C, n_head = 2, 16, 128, 4

    key = jax.random.PRNGKey(0)
    kx, kq, kqb, kk, kkb, kv, kvb, kp, kpb = jax.random.split(key, 9)

    params = dict(
        q_w=jax.random.normal(kq, (C, C), jnp.float32) * 0.02,
        q_b=jax.random.normal(kqb, (C,), jnp.float32) * 0.02,
        k_w=jax.random.normal(kk, (C, C), jnp.float32) * 0.02,
        k_b=jax.random.normal(kkb, (C,), jnp.float32) * 0.02,
        v_w=jax.random.normal(kv, (C, C), jnp.float32) * 0.02,
        v_b=jax.random.normal(kvb, (C,), jnp.float32) * 0.02,
        proj_w=jax.random.normal(kp, (C, C), jnp.float32) * 0.02,
        proj_b=jax.random.normal(kpb, (C,), jnp.float32) * 0.02,
    )
    x = jax.random.normal(kx, (B, T, C), jnp.float32)

    out = jax.block_until_ready(self_attention(x, params, n_head))
    ref = self_attention_reference(x, params, n_head)

    assert out.shape == (B, T, C), out.shape
    assert bool(jnp.all(jnp.isfinite(out)))
    # Loose tolerance accounts for the approx reciprocal in the softmax.
    assert bool(jnp.allclose(out, ref, rtol=2e-2, atol=2e-3)), \
        float(jnp.max(jnp.abs(out - ref)))

    # TODO(synk): attn_drop / resid_drop (nn.Dropout) are identity here (eval
    # semantics); stochastic training-mode dropout is not implemented.
    print("KERNEL_OK")
</pallas_src>

<mosaic_0001>
module attributes {stable_mosaic.version = 11 : i64} {
  func.func @_self_attention_kernel(%arg0: i32, %arg1: memref<1x16x128xf32, #tpu.memory_space<vmem>>, %arg2: memref<128x384xf32, #tpu.memory_space<vmem>>, %arg3: memref<1x384xf32, #tpu.memory_space<vmem>>, %arg4: memref<128x128xf32, #tpu.memory_space<vmem>>, %arg5: memref<1x128xf32, #tpu.memory_space<vmem>>, %arg6: memref<1x16x128xf32, #tpu.memory_space<vmem>>) attributes {dimension_semantics = [#tpu.dimension_semantics<parallel>], iteration_bounds = array<i64: 2>, scalar_prefetch = 0 : i64, scratch_operands = 0 : i64, tpu.core_type = #tpu.core_type<tc>, window_params = [{transform_indices = @transform_0, window_bounds = array<i64: 1, 16, 128>}, {pipeline_mode = #tpu.pipeline_mode<synchronous>, transform_indices = @transform_1, window_bounds = array<i64: 128, 384>}, {pipeline_mode = #tpu.pipeline_mode<synchronous>, transform_indices = @transform_2, window_bounds = array<i64: 1, 384>}, {pipeline_mode = #tpu.pipeline_mode<synchronous>, transform_indices = @transform_3, window_bounds = array<i64: 128, 128>}, {pipeline_mode = #tpu.pipeline_mode<synchronous>, transform_indices = @transform_4, window_bounds = array<i64: 1, 128>}, {transform_indices = @transform_5, window_bounds = array<i64: 1, 16, 128>}]} {
    %c0 = arith.constant 0 : index
    %c0_0 = arith.constant 0 : index
    %c0_1 = arith.constant 0 : index
    %0 = vector.load %arg1[%c0, %c0_0, %c0_1] : memref<1x16x128xf32, #tpu.memory_space<vmem>>, vector<1x16x128xf32>
    %1 = vector.shape_cast %0 : vector<1x16x128xf32> to vector<16x128xf32>
    %c0_2 = arith.constant 0 : index
    %c0_3 = arith.constant 0 : index
    %2 = vector.load %arg2[%c0_2, %c0_3] : memref<128x384xf32, #tpu.memory_space<vmem>>, vector<128x384xf32>
    %cst = arith.constant dense<0.000000e+00> : vector<16x384xf32>
    %3 = tpu.matmul %1, %2, %cst {dimension_numbers = #tpu.dot_dimension_numbers<[1], [0], [0], [1], [0, 0, 1, 1], [], []>} : vector<16x128xf32>, vector<128x384xf32>, vector<16x384xf32> -> vector<16x384xf32>
    %c0_4 = arith.constant 0 : index
    %c0_5 = arith.constant 0 : index
    %4 = vector.load %arg3[%c0_4, %c0_5] : memref<1x384xf32, #tpu.memory_space<vmem>>, vector<1x384xf32>
    %5 = vector.broadcast %4 : vector<1x384xf32> to vector<16x384xf32>
    %6 = arith.addf %3, %5 : vector<16x384xf32>
    %cst_6 = arith.constant 0.000000e+00 : f32
    %7 = vector.broadcast %cst_6 : f32 to vector<16x128xf32>
    %8 = vector.extract_strided_slice %6 {offsets = [0, 0], sizes = [16, 32], strides = [1, 1]} : vector<16x384xf32> to vector<16x32xf32>
    %9 = vector.extract_strided_slice %6 {offsets = [0, 128], sizes = [16, 32], strides = [1, 1]} : vector<16x384xf32> to vector<16x32xf32>
    %10 = vector.extract_strided_slice %6 {offsets = [0, 256], sizes = [16, 32], strides = [1, 1]} : vector<16x384xf32> to vector<16x32xf32>
    %cst_7 = arith.constant dense<0.000000e+00> : vector<16x16xf32>
    %11 = tpu.matmul %8, %9, %cst_7 {dimension_numbers = #tpu.dot_dimension_numbers<[1], [1], [0], [0], [0, 0, 1, 0], [], []>} : vector<16x32xf32>, vector<16x32xf32>, vector<16x16xf32> -> vector<16x16xf32>
    %cst_8 = arith.constant 0.176776692 : f32
    %12 = vector.broadcast %cst_8 : f32 to vector<16x16xf32>
    %13 = arith.mulf %11, %12 : vector<16x16xf32>
    %cst_9 = arith.constant dense<0xFF800000> : vector<16xf32>
    %14 = vector.multi_reduction <maximumf>, %13, %cst_9 [1] : vector<16x16xf32> to vector<16xf32>
    %15 = vector.shape_cast %14 : vector<16xf32> to vector<16x1xf32>
    %16 = vector.broadcast %15 : vector<16x1xf32> to vector<16x16xf32>
    %17 = arith.subf %13, %16 : vector<16x16xf32>
    %18 = math.exp %17 : vector<16x16xf32>
    %cst_10 = arith.constant dense<0.000000e+00> : vector<16xf32>
    %19 = vector.multi_reduction <add>, %18, %cst_10 [1] : vector<16x16xf32> to vector<16xf32>
    %20 = vector.shape_cast %19 : vector<16xf32> to vector<16x1xf32>
    %21 = tpu.reciprocal %20 {approx = true} : vector<16x1xf32> -> vector<16x1xf32>
    %22 = vector.broadcast %21 : vector<16x1xf32> to vector<16x16xf32>
    %23 = arith.mulf %18, %22 : vector<16x16xf32>
    %cst_11 = arith.constant dense<0.000000e+00> : vector<16x32xf32>
    %24 = tpu.matmul %23, %10, %cst_11 {dimension_numbers = #tpu.dot_dimension_numbers<[1], [0], [0], [1], [0, 0, 1, 1], [], []>} : vector<16x16xf32>, vector<16x32xf32>, vector<16x32xf32> -> vector<16x32xf32>
    %c0_12 = arith.constant 0 : index
    %c0_13 = arith.constant 0 : index
    %25 = vector.load %arg4[%c0_12, %c0_13] : memref<128x128xf32, #tpu.memory_space<vmem>>, vector<32x128xf32>
    %cst_14 = arith.constant dense<0.000000e+00> : vector<16x128xf32>
    %26 = tpu.matmul %24, %25, %cst_14 {dimension_numbers = #tpu.dot_dimension_numbers<[1], [0], [0], [1], [0, 0, 1, 1], [], []>} : vector<16x32xf32>, vector<32x128xf32>, vector<16x128xf32> -> vector<16x128xf32>
    %27 = arith.addf %7, %26 : vector<16x128xf32>
    %28 = vector.extract_strided_slice %6 {offsets = [0, 32], sizes = [16, 32], strides = [1, 1]} : vector<16x384xf32> to vector<16x32xf32>
    %29 = vector.extract_strided_slice %6 {offsets = [0, 160], sizes = [16, 32], strides = [1, 1]} : vector<16x384xf32> to vector<16x32xf32>
    %30 = vector.extract_strided_slice %6 {offsets = [0, 288], sizes = [16, 32], strides = [1, 1]} : vector<16x384xf32> to vector<16x32xf32>
    %cst_15 = arith.constant dense<0.000000e+00> : vector<16x16xf32>
    %31 = tpu.matmul %28, %29, %cst_15 {dimension_numbers = #tpu.dot_dimension_numbers<[1], [1], [0], [0], [0, 0, 1, 0], [], []>} : vector<16x32xf32>, vector<16x32xf32>, vector<16x16xf32> -> vector<16x16xf32>
    %cst_16 = arith.constant 0.176776692 : f32
    %32 = vector.broadcast %cst_16 : f32 to vector<16x16xf32>
    %33 = arith.mulf %31, %32 : vector<16x16xf32>
    %cst_17 = arith.constant dense<0xFF800000> : vector<16xf32>
    %34 = vector.multi_reduction <maximumf>, %33, %cst_17 [1] : vector<16x16xf32> to vector<16xf32>
    %35 = vector.shape_cast %34 : vector<16xf32> to vector<16x1xf32>
    %36 = vector.broadcast %35 : vector<16x1xf32> to vector<16x16xf32>
    %37 = arith.subf %33, %36 : vector<16x16xf32>
    %38 = math.exp %37 : vector<16x16xf32>
    %cst_18 = arith.constant dense<0.000000e+00> : vector<16xf32>
    %39 = vector.multi_reduction <add>, %38, %cst_18 [1] : vector<16x16xf32> to vector<16xf32>
    %40 = vector.shape_cast %39 : vector<16xf32> to vector<16x1xf32>
    %41 = tpu.reciprocal %40 {approx = true} : vector<16x1xf32> -> vector<16x1xf32>
    %42 = vector.broadcast %41 : vector<16x1xf32> to vector<16x16xf32>
    %43 = arith.mulf %38, %42 : vector<16x16xf32>
    %cst_19 = arith.constant dense<0.000000e+00> : vector<16x32xf32>
    %44 = tpu.matmul %43, %30, %cst_19 {dimension_numbers = #tpu.dot_dimension_numbers<[1], [0], [0], [1], [0, 0, 1, 1], [], []>} : vector<16x16xf32>, vector<16x32xf32>, vector<16x32xf32> -> vector<16x32xf32>
    %c32 = arith.constant 32 : index
    %c0_20 = arith.constant 0 : index
    %45 = vector.load %arg4[%c32, %c0_20] : memref<128x128xf32, #tpu.memory_space<vmem>>, vector<32x128xf32>
    %cst_21 = arith.constant dense<0.000000e+00> : vector<16x128xf32>
    %46 = tpu.matmul %44, %45, %cst_21 {dimension_numbers = #tpu.dot_dimension_numbers<[1], [0], [0], [1], [0, 0, 1, 1], [], []>} : vector<16x32xf32>, vector<32x128xf32>, vector<16x128xf32> -> vector<16x128xf32>
    %47 = arith.addf %27, %46 : vector<16x128xf32>
    %48 = vector.extract_strided_slice %6 {offsets = [0, 64], sizes = [16, 32], strides = [1, 1]} : vector<16x384xf32> to vector<16x32xf32>
    %49 = vector.extract_strided_slice %6 {offsets = [0, 192], sizes = [16, 32], strides = [1, 1]} : vector<16x384xf32> to vector<16x32xf32>
    %50 = vector.extract_strided_slice %6 {offsets = [0, 320], sizes = [16, 32], strides = [1, 1]} : vector<16x384xf32> to vector<16x32xf32>
    %cst_22 = arith.constant dense<0.000000e+00> : vector<16x16xf32>
    %51 = tpu.matmul %48, %49, %cst_22 {dimension_numbers = #tpu.dot_dimension_numbers<[1], [1], [0], [0], [0, 0, 1, 0], [], []>} : vector<16x32xf32>, vector<16x32xf32>, vector<16x16xf32> -> vector<16x16xf32>
    %cst_23 = arith.constant 0.176776692 : f32
    %52 = vector.broadcast %cst_23 : f32 to vector<16x16xf32>
    %53 = arith.mulf %51, %52 : vector<16x16xf32>
    %cst_24 = arith.constant dense<0xFF800000> : vector<16xf32>
    %54 = vector.multi_reduction <maximumf>, %53, %cst_24 [1] : vector<16x16xf32> to vector<16xf32>
    %55 = vector.shape_cast %54 : vector<16xf32> to vector<16x1xf32>
    %56 = vector.broadcast %55 : vector<16x1xf32> to vector<16x16xf32>
    %57 = arith.subf %53, %56 : vector<16x16xf32>
    %58 = math.exp %57 : vector<16x16xf32>
    %cst_25 = arith.constant dense<0.000000e+00> : vector<16xf32>
    %59 = vector.multi_reduction <add>, %58, %cst_25 [1] : vector<16x16xf32> to vector<16xf32>
    %60 = vector.shape_cast %59 : vector<16xf32> to vector<16x1xf32>
    %61 = tpu.reciprocal %60 {approx = true} : vector<16x1xf32> -> vector<16x1xf32>
    %62 = vector.broadcast %61 : vector<16x1xf32> to vector<16x16xf32>
    %63 = arith.mulf %58, %62 : vector<16x16xf32>
    %cst_26 = arith.constant dense<0.000000e+00> : vector<16x32xf32>
    %64 = tpu.matmul %63, %50, %cst_26 {dimension_numbers = #tpu.dot_dimension_numbers<[1], [0], [0], [1], [0, 0, 1, 1], [], []>} : vector<16x16xf32>, vector<16x32xf32>, vector<16x32xf32> -> vector<16x32xf32>
    %c64 = arith.constant 64 : index
    %c0_27 = arith.constant 0 : index
    %65 = vector.load %arg4[%c64, %c0_27] : memref<128x128xf32, #tpu.memory_space<vmem>>, vector<32x128xf32>
    %cst_28 = arith.constant dense<0.000000e+00> : vector<16x128xf32>
    %66 = tpu.matmul %64, %65, %cst_28 {dimension_numbers = #tpu.dot_dimension_numbers<[1], [0], [0], [1], [0, 0, 1, 1], [], []>} : vector<16x32xf32>, vector<32x128xf32>, vector<16x128xf32> -> vector<16x128xf32>
    %67 = arith.addf %47, %66 : vector<16x128xf32>
    %68 = vector.extract_strided_slice %6 {offsets = [0, 96], sizes = [16, 32], strides = [1, 1]} : vector<16x384xf32> to vector<16x32xf32>
    %69 = vector.extract_strided_slice %6 {offsets = [0, 224], sizes = [16, 32], strides = [1, 1]} : vector<16x384xf32> to vector<16x32xf32>
    %70 = vector.extract_strided_slice %6 {offsets = [0, 352], sizes = [16, 32], strides = [1, 1]} : vector<16x384xf32> to vector<16x32xf32>
    %cst_29 = arith.constant dense<0.000000e+00> : vector<16x16xf32>
    %71 = tpu.matmul %68, %69, %cst_29 {dimension_numbers = #tpu.dot_dimension_numbers<[1], [1], [0], [0], [0, 0, 1, 0], [], []>} : vector<16x32xf32>, vector<16x32xf32>, vector<16x16xf32> -> vector<16x16xf32>
    %cst_30 = arith.constant 0.176776692 : f32
    %72 = vector.broadcast %cst_30 : f32 to vector<16x16xf32>
    %73 = arith.mulf %71, %72 : vector<16x16xf32>
    %cst_31 = arith.constant dense<0xFF800000> : vector<16xf32>
    %74 = vector.multi_reduction <maximumf>, %73, %cst_31 [1] : vector<16x16xf32> to vector<16xf32>
    %75 = vector.shape_cast %74 : vector<16xf32> to vector<16x1xf32>
    %76 = vector.broadcast %75 : vector<16x1xf32> to vector<16x16xf32>
    %77 = arith.subf %73, %76 : vector<16x16xf32>
    %78 = math.exp %77 : vector<16x16xf32>
    %cst_32 = arith.constant dense<0.000000e+00> : vector<16xf32>
    %79 = vector.multi_reduction <add>, %78, %cst_32 [1] : vector<16x16xf32> to vector<16xf32>
    %80 = vector.shape_cast %79 : vector<16xf32> to vector<16x1xf32>
    %81 = tpu.reciprocal %80 {approx = true} : vector<16x1xf32> -> vector<16x1xf32>
    %82 = vector.broadcast %81 : vector<16x1xf32> to vector<16x16xf32>
    %83 = arith.mulf %78, %82 : vector<16x16xf32>
    %cst_33 = arith.constant dense<0.000000e+00> : vector<16x32xf32>
    %84 = tpu.matmul %83, %70, %cst_33 {dimension_numbers = #tpu.dot_dimension_numbers<[1], [0], [0], [1], [0, 0, 1, 1], [], []>} : vector<16x16xf32>, vector<16x32xf32>, vector<16x32xf32> -> vector<16x32xf32>
    %c96 = arith.constant 96 : index
    %c0_34 = arith.constant 0 : index
    %85 = vector.load %arg4[%c96, %c0_34] : memref<128x128xf32, #tpu.memory_space<vmem>>, vector<32x128xf32>
    %cst_35 = arith.constant dense<0.000000e+00> : vector<16x128xf32>
    %86 = tpu.matmul %84, %85, %cst_35 {dimension_numbers = #tpu.dot_dimension_numbers<[1], [0], [0], [1], [0, 0, 1, 1], [], []>} : vector<16x32xf32>, vector<32x128xf32>, vector<16x128xf32> -> vector<16x128xf32>
    %87 = arith.addf %67, %86 : vector<16x128xf32>
    %c0_36 = arith.constant 0 : index
    %c0_37 = arith.constant 0 : index
    %88 = vector.load %arg5[%c0_36, %c0_37] : memref<1x128xf32, #tpu.memory_space<vmem>>, vector<1x128xf32>
    %89 = vector.broadcast %88 : vector<1x128xf32> to vector<16x128xf32>
    %90 = arith.addf %87, %89 : vector<16x128xf32>
    %c0_38 = arith.constant 0 : index
    %c0_39 = arith.constant 0 : index
    %c0_40 = arith.constant 0 : index
    %91 = vector.load %arg6[%c0_38, %c0_39, %c0_40] : memref<1x16x128xf32, #tpu.memory_space<vmem>>, vector<1x16x128xf32>
    %92 = vector.shape_cast %91 : vector<1x16x128xf32> to vector<16x128xf32>
    %93 = vector.shape_cast %90 : vector<16x128xf32> to vector<1x16x128xf32>
    tpu.vector_store %arg6[%c0_38, %c0_39, %c0_40], %93 {strides = array<i32>} : memref<1x16x128xf32, #tpu.memory_space<vmem>>, vector<1x16x128xf32>,
    return
  }
  func.func @transform_0(%arg0: i32) -> (i32, i32, i32) {
    %c0_i32 = arith.constant 0 : i32
    %c0_i32_0 = arith.constant 0 : i32
    %c0_i32_1 = arith.constant 0 : i32
    return %arg0, %c0_i32, %c0_i32_0 : i32, i32, i32
  }
  func.func @transform_1(%arg0: i32) -> (i32, i32) {
    %c0_i32 = arith.constant 0 : i32
    %c0_i32_0 = arith.constant 0 : i32
    %c0_i32_1 = arith.constant 0 : i32
    return %c0_i32, %c0_i32_0 : i32, i32
  }
  func.func @transform_2(%arg0: i32) -> (i32, i32) {
    %c0_i32 = arith.constant 0 : i32
    %c0_i32_0 = arith.constant 0 : i32
    %c0_i32_1 = arith.constant 0 : i32
    return %c0_i32, %c0_i32_0 : i32, i32
  }
  func.func @transform_3(%arg0: i32) -> (i32, i32) {
    %c0_i32 = arith.constant 0 : i32
    %c0_i32_0 = arith.constant 0 : i32
    %c0_i32_1 = arith.constant 0 : i32
    return %c0_i32, %c0_i32_0 : i32, i32
  }
  func.func @transform_4(%arg0: i32) -> (i32, i32) {
    %c0_i32 = arith.constant 0 : i32
    %c0_i32_0 = arith.constant 0 : i32
    %c0_i32_1 = arith.constant 0 : i32
    return %c0_i32, %c0_i32_0 : i32, i32
  }
  func.func @transform_5(%arg0: i32) -> (i32, i32, i32) {
    %c0_i32 = arith.constant 0 : i32
    %c0_i32_0 = arith.constant 0 : i32
    %c0_i32_1 = arith.constant 0 : i32
    return %arg0, %c0_i32, %c0_i32_0 : i32, i32, i32
  }
}

</mosaic_0001>

<bundles_post_ra>
// kernel: tpu_custom_call.1
= control target key start
LH: loop header
LB: loop body
LE: loop exit
PB: predicated region body
PF: predicated region fallthrough
CT: control target
= control target key end

     0   :  { %10 = vsyncpa [#allocation3], 0  ;;  %s2871_s0 = inlined_call_operand.hbm [shape: f32[2,16,128], index: 0, kind: input, shape index: {}]   ;;  %s2872_s1 = inlined_call_operand.hbm [shape: f32[128,384], index: 1, kind: input, shape index: {}]   ;;  %s2873_s2 = inlined_call_operand.vmem [shape: f32[1,384], index: 2, kind: input, shape index: {}]   ;;  %s2874_s3 = inlined_call_operand.hbm [shape: f32[128,128], index: 3, kind: input, shape index: {}]   ;;  %s2875_s4 = inlined_call_operand.vmem [shape: f32[1,128], index: 4, kind: input, shape index: {}]   ;;  %s2876_s5 = inlined_call_operand.hbm [shape: f32[2,16,128], index: 5, kind: output, shape index: {}]  }
   0x1   :  { %12 = vsyncpa [#allocation3 + $0x1], 0 }
   0x2   :  { %13 = vsyncpa [#allocation6], 0 }
   0x3   :  { %14 = vsyncpa [#allocation4], 0 }
   0x4   :  { %16 = vsyncpa [#allocation4 + $0x1], 0  ;;  %s2499_s18 = smov 0   ;;  %s2501_s19 = smov 0  }
   0x5   :  { %s2503_s20 = smov 0   ;;  %s2505_s21 = smov 0  }
   0x6 LB: > { %s2520_s22 = sadd.s32 4294967295, %s2453_s21   ;;  %s1754_s23 = sadd.s32 4294967294, %s2453_s21   ;;  %s2453_s21 = sphi %s2505_s21, %s2898_s21   ;;  %s2449_s20 = sphi %s2503_s20, %s2897_s20   ;;  %s2445_s19 = sphi %s2501_s19, %s2896_s19   ;;  %s2441_s18 = sphi %s2499_s18, %s2895_s18  }
   0x7   : > { %p42_p0 = scmp.ne.s32.totalorder %s2445_s19, %s2441_s18  ;;  %p2877_p1 = scmp.eq.s32.totalorder %s2520_s22, 0 }
   0x8   : > { %p156_p3 = scmp.eq.s32.totalorder %s1754_s23, 1  ;;  %p1755_p5 = scmp.ge.s32.totalorder %s2453_s21, 1 }
   0x9   : > { %p2529_p4 = por %p2877_p1, %p42_p0  ;;  %p163_p7 = scmp.lt.s32.totalorder %s2453_s21, 3 }
   0xa   : > { %p2534_p6 = por %p156_p3, %p42_p0  ;;  %s2455_s27 = smov [#allocation5]  }
   0xb   : > { %s2880_s24 = scalar_select %p2529_p4, 1, 0 }
   0xc   : > { %s2881_s25 = scalar_select %p2534_p6, 1, 0 }
   0xd   : > { %p2539_p8 = pnand %p1755_p5, %p163_p7  ;;  %s175_s28 = sshll.u32 %s2455_s27, 4  ;;  %s2543_s28 = int_to_ptr.vmem [resolvable:$true] %s175_s28 }
   0xe   : > { %s2456_s30 = smov [#allocation7]   ;;  %s2297_s9 = scalar_lea.hbm %s2872_s1, 6144 }
   0xf   : > { %p2170_p9 = pneg %p2539_p8  ;;  %s191_s6 = sshll.u32 %s2456_s30, 4  ;;  %s2554_s6 = int_to_ptr.vmem [resolvable:$true] %s191_s6 }
  0x10   : > { %p2298_p12 = scmp.ne.s32.totalorder %s2872_s1, %s2297_s9  ;;  %p2304_p5 = scmp.lt.u32.totalorder %s2297_s9, %s2872_s1 }
  0x11   : > { %p2550_p11 = pnand %p2170_p9, %p2877_p1 }
  0x13   : > { %p2299_p13 = pneg %p2550_p11 }
  0x15   : > { %p2300_p0 = pnand %p2299_p13, %p2298_p12 }
  0x17   : > { %p2301_p3 = pneg %p2300_p0 }
  0x19   : > { %p2306_p7 = pnand %p2304_p5, %p2301_p3 }
  0x1b   : > { %2309 = shalt.err (!%p2306_p7)
}
  0x1c   : > { %s2310_s14 = scalar_lea.vmem %s2543_s28, 6144  ;;  %p2318_p2 = scmp.lt.s32.totalorder %s2543_s28, %s2543_s28 }
  0x1d   : > { %p2311_p9 = scmp.ne.s32.totalorder %s2543_s28, %s2310_s14  ;;  %p2319_p12 = scmp.lt.s32.totalorder %s2310_s14, %s2310_s14 }
  0x1f   : > { %p2313_p10 = pnand %p2311_p9, %p2299_p13  ;;  %p2320_p0 = por %p2319_p12, %p2318_p2 }
  0x21   : > { %p2314_p1 = pneg %p2313_p10 }
  0x23   : > { %p2321_p6 = pnand %p2320_p0, %p2314_p1 }
  0x25   : > { %2324 = shalt.err (!%p2321_p6)
}
  0x26   : > { %s2457_s15 = smov 384   ;;  %s2458_s16 = smov 24  }
  0x27   : > { %2173 = dma.hbm_to_vmem [thread:$0]  (!%p2550_p11), %s2872_s1, 6144, %s2543_s28, [#allocation6], %s2457_s15, %s2457_s15, %s2458_s16  }
  0x28   : > { %s2325_s7 = scalar_lea.hbm %s2874_s3, 2048 }
  0x29   : > { %p2326_p2 = scmp.ne.s32.totalorder %s2874_s3, %s2325_s7  ;;  %p2332_p10 = scmp.lt.u32.totalorder %s2325_s7, %s2874_s3 }
  0x2b   : > { %p2328_p1 = pnand %p2326_p2, %p2299_p13 }
  0x2d   : > { %p2329_p6 = pneg %p2328_p1 }
  0x2f   : > { %p2334_p3 = pnand %p2332_p10, %p2329_p6 }
  0x31   : > { %2337 = shalt.err (!%p2334_p3)
}
  0x32   : > { %s2338_s28 = scalar_lea.vmem %s2554_s6, 2048  ;;  %p2346_p12 = scmp.lt.s32.totalorder %s2554_s6, %s2554_s6 }
  0x33   : > { %p2339_p5 = scmp.ne.s32.totalorder %s2554_s6, %s2338_s28  ;;  %p2347_p0 = scmp.lt.s32.totalorder %s2338_s28, %s2338_s28 }
  0x35   : > { %p2341_p7 = pnand %p2339_p5, %p2299_p13  ;;  %p2348_p2 = por %p2347_p0, %p2346_p12 }
  0x37   : > { %p2342_p9 = pneg %p2341_p7 }
  0x39   : > { %p2349_p1 = pnand %p2348_p2, %p2342_p9 }
  0x3b   : > { %2352 = shalt.err (!%p2349_p1)
}
  0x3c   : > { %s2459_s12 = smov 128   ;;  %s2460_s13 = smov 8  }
  0x3d   : > { %2176 = dma.hbm_to_vmem [thread:$0]  (!%p2550_p11), %s2874_s3, 2048, %s2554_s6, [#allocation6], %s2459_s12, %s2459_s12, %s2460_s13  }
  0x3e   : > { %s2612_s16 = sadd.s32 1, %s2453_s21   ;;  %s29_s23 = sadd.s32 1, %s2449_s20 }
  0x3f   : > { %s26_s17 = ssub.s32 %s2453_s21, %s2612_s16  ;;  %p36_p6 = scmp.ne.s32.totalorder %s2449_s20, %s2445_s19 }
  0x40   : > { %p27_p13 = scmp.eq.s32.totalorder %s26_s17, 0  ;;  %p37_p10 = scmp.eq.s32.totalorder %s2453_s21, 0 }
  0x41   : > { %p2884_p5 = scmp.eq.s32.totalorder %s2520_s22, 1  ;;  %p2187_p9 = scmp.lt.s32.totalorder %s2453_s21, 2 }
  0x42   : > { %s2621_s27 = scalar_select %p27_p13, %s2449_s20, %s29_s23  }
  0x43   : > { %p38_p3 = por %p37_p10, %p36_p6  ;;  %p2625_p7 = por %p2884_p5, %p36_p6 }
  0x44   : > { %s208_s30 = sand.u32 1, %s2449_s20   ;;  %s1805_s6 = sshll.u32 %s2453_s21, 8 }
  0x45   : > { %s2885_s29 = scalar_select %p2625_p7, 1, 0 }
  0x46   : > { %s1759_s7 = sshll.u32 %s208_s30, 4  ;;  %s2635_s10 = scalar_lea.hbm %s2871_s0, %s1805_s6 }
  0x47   : > { %s212_s11 = scalar_lea.vmem [#allocation2], %s1759_s7  ;;  %p2639_p11 = pnand %p2187_p9, %p38_p3 }
  0x48   : > { %s219_s28 = sshll.u32 %s212_s11, 4  ;;  %s2643_s15 = scalar_lea.sflag [#allocation3], %s208_s30  ;;  %s2637_s28 = int_to_ptr.vmem [resolvable:$true] %s219_s28 }
  0x49   : > { %s2353_s17 = scalar_lea.hbm %s2635_s10, 256  ;;  %p2355_p0 = pneg %p2639_p11 }
  0x4a   : > { %p2354_p12 = scmp.ne.s32.totalorder %s2635_s10, %s2353_s17  ;;  %s2358_s6 = scalar_lea.hbm %s2871_s0, 512 }
  0x4b   : > { %p2359_p13 = scmp.lt.u32.totalorder %s2635_s10, %s2871_s0  ;;  %p2360_p6 = scmp.lt.u32.totalorder %s2358_s6, %s2353_s17 }
  0x4c   : > { %p2356_p2 = pnand %p2355_p0, %p2354_p12  ;;  %p2362_p3 = scmp.lt.u32.totalorder %s2353_s17, %s2635_s10 }
  0x4d   : > { %p2361_p10 = por %p2360_p6, %p2359_p13 }
  0x4e   : > { %p2357_p1 = pneg %p2356_p2 }
  0x4f   : > { %p2363_p5 = por %p2362_p3, %p2361_p10 }
  0x51   : > { %p2364_p9 = pnand %p2363_p5, %p2357_p1 }
  0x53   : > { %2367 = shalt.err (!%p2364_p9)
}
  0x54   : > { %s2368_s30 = scalar_lea.vmem %s2637_s28, 256  ;;  %s2461_s11 = smov [#allocation2]  }
  0x55   : > { %p2369_p12 = scmp.ne.s32.totalorder %s2637_s28, %s2368_s30  ;;  %s2373_s23 = sshll.u32 %s2461_s11, 4  ;;  %s2374_s23 = int_to_ptr.vmem [resolvable:$false] %s2373_s23 }
  0x56   : > { %s2375_s7 = scalar_lea.vmem %s2374_s23, 512  ;;  %p2376_p4 = scmp.lt.s32.totalorder %s2637_s28, %s2374_s23 }
  0x57   : > { %p2371_p2 = pnand %p2369_p12, %p2355_p0  ;;  %p2377_p13 = scmp.lt.s32.totalorder %s2375_s7, %s2368_s30 }
  0x59   : > { %p2372_p7 = pneg %p2371_p2  ;;  %p2378_p6 = por %p2377_p13, %p2376_p4 }
  0x5b   : > { %p2379_p10 = pnand %p2378_p6, %p2372_p7 }
  0x5d   : > { %2382 = shalt.err (!%p2379_p10)
}
  0x5e   : > { %2180 = dma.hbm_to_vmem [thread:$0]  (!%p2639_p11), %s2635_s10, 256, %s2637_s28, %s2643_s15, %s2459_s12, %s2459_s12, %s2460_s13  }
  0x5f   : > { %231 = sbr.rel (%p2539_p8) target bundleno = 2975 (0xb9f), region = 40  ;;  %s2677_s17 = sand.u32 (!%p2539_p8), 1, %s2445_s19  }
  0x60   : > { %s1763_s6 = sshll.u32 (!%p2539_p8), %s2677_s17, 4  ;;  %s234_s8 = scalar_lea.sflag (!%p2539_p8), [#allocation3], %s2677_s17 }
  0x61   : > { %s2683_s14 = scalar_lea.vmem (!%p2539_p8), [#allocation2], %s1763_s6  ;;  %p2887_p4 = scmp.ne.s32.totalorder (!%p2539_p8), %s2880_s24, 0 }
  0x66   : > { %2428 = dma.done.wait (%p2887_p4), %s234_s8, 256  }
  0x67   : > { %2430 = vsyncadd (%p2887_p4), %s234_s8, 4294967040  ;;  %p2888_p7 = scmp.eq.s32.totalorder %s2520_s22, 0 }
  0x69   : > { %2432 = dma.done.wait (%p2888_p7), [#allocation6], 8192   ;;  %p2889_p8 = pmov %p2888_p7 }
  0x6a   : > { %v2462_v0 = vmov 0.0   ;;  %v275_v1 = vld [vmem:[#allocation5 + $0x8] sm:$0xff]  ;;  %v278_v2 = vld [vmem:[#allocation5 + $0x20] sm:$0xff]  ;;  %v277_v5 = vld [vmem:[#allocation5 + $0x18] sm:$0xff]  ;;  %v324_v51 = vlaneseq  ;;  %vm491_vm0 = vcmask 261120   ;;  %s2463_s12 = smov 96  }
  0x6b   : > { %2434 = vsyncadd (%p2889_p8), [#allocation6], 4294959104  ;;  %403 = vmatprep.mubr.f32.mxu0 %v2462_v0  ;;  %v274_v3 = vld [vmem:[#allocation5] sm:$0xff]  ;;  %v2016_v4 = vpack.c.bf16 %v278_v2, %v275_v1  ;;  %v281_v6 = vld [vmem:[#allocation5 + $0x38] sm:$0xff]  ;;  %vm581_vm2 = vcmask 130048   ;;  %s2464_s13 = smov 64  }
  0x6c   : > { %v284_v7 = vld [vmem:[#allocation5 + $0x50] sm:$0xff]  ;;  %v2018_v8 = vpack.c.bf16 %v277_v5, %v274_v3  ;;  %v283_v11 = vld [vmem:[#allocation5 + $0x48] sm:$0xff]  ;;  %v290_v13 = vld [vmem:[#allocation5 + $0x80] sm:$0xff]  ;;  %v2700_v52 = vshrl.u32 %v324_v51, 7  ;;  %s2465_s10 = smov 32   ;;  %s271_s28 = scalar_lea.vmem [#allocation8], %s1763_s6 }
  0x6d   : > { %v2020_v9 = vpack.c.bf16 %v284_v7, %v281_v6  ;;  %v280_v10 = vld [vmem:[#allocation5 + $0x30] sm:$0xff]  ;;  %v287_v12 = vld [vmem:[#allocation5 + $0x68] sm:$0xff]  ;;  %2017 = vmatprep.subr.bf16.mxu0 %v2016_v4  ;;  %v286_v16 = vld [vmem:[#allocation5 + $0x60] sm:$0xff]  ;;  %s1662_s15 = sshll.u32 %s271_s28, 4  ;;  %s1806_s11 = sshll.u32 %s2520_s22, 8  ;;  %s2822_s15 = int_to_ptr.vmem [resolvable:$true] %s1662_s15 }
  0x6e   : > { %2019 = vmatpush1.bf16.msra.mxu0 %v2018_v8  ;;  %v2022_v14 = vpack.c.bf16 %v283_v11, %v280_v10  ;;  %v2024_v15 = vpack.c.bf16 %v290_v13, %v287_v12  ;;  %v289_v17 = vld [vmem:[#allocation5 + $0x78] sm:$0xff]  ;;  %v296_v19 = vld [vmem:[#allocation5 + $0xb0] sm:$0xff]  ;;  %v295_v23 = vld [vmem:[#allocation5 + $0xa8] sm:$0xff]  ;;  %v326_v61 = vsub.s32 0, %v2700_v52  ;;  %v330_v3 = vsub.s32 1, %v2700_v52  ;;  %s2827_s8 = scalar_lea.hbm %s2876_s5, %s1806_s11  ;;  %s1649_s6 = scalar_lea.sflag [#allocation4], %s2677_s17 }
  0x6f   : > { %2021 = vmatprep.subr.bf16.mxu0 %v2020_v9  ;;  %v293_v18 = vld [vmem:[#allocation5 + $0x98] sm:$0xff]  ;;  %v2026_v20 = vpack.c.bf16 %v289_v17, %v286_v16  ;;  %v292_v22 = vld [vmem:[#allocation5 + $0x90] sm:$0xff]  ;;  %v299_v24 = vld [vmem:[#allocation5 + $0xc8] sm:$0xff]  ;;  %p2892_p0 = scmp.ne.s32.totalorder %s2885_s29, 0  ;;  %s2466_s22 = smov [#allocation8]  }
  0x70   : > { %v2028_v21 = vpack.c.bf16 %v296_v19, %v293_v18  ;;  %v302_v25 = vld [vmem:[#allocation5 + $0xe0] sm:$0xff]  ;;  %v2030_v27 = vpack.c.bf16 %v295_v23, %v292_v22  ;;  %v301_v30 = vld [vmem:[#allocation5 + $0xd8] sm:$0xff]  ;;  %v308_v32 = vld [vmem:[#allocation5 + $0x110] sm:$0xff]  ;;  %s2387_s24 = sshll.u32 %s2466_s22, 4  ;;  %s2388_s24 = int_to_ptr.vmem [resolvable:$false] %s2387_s24 }
  0x71   : > { %v272_v26 = vld [vmem:[%s2683_s14] sm:$0xff]  ;;  %v2032_v28 = vpack.c.bf16 %v302_v25, %v299_v24  ;;  %v305_v31 = vld [vmem:[#allocation5 + $0xf8] sm:$0xff]  ;;  %v307_v36 = vld [vmem:[#allocation5 + $0x108] sm:$0xff]  ;;  %s2389_s26 = scalar_lea.vmem %s2388_s24, 512  ;;  %p2390_p5 = scmp.lt.s32.totalorder %s2822_s15, %s2388_s24 }
  0x72   : > { %2023 = vmatpush1.bf16.msra.mxu0 %v2022_v14  ;;  %1913 = vmatprep.mubr.f32.mxu1 %v272_v26  ;;  %v298_v29 = vld [vmem:[#allocation5 + $0xc0] sm:$0xff]  ;;  %v2036_v34 = vpack.c.bf16 %v308_v32, %v305_v31  ;;  %v304_v35 = vld [vmem:[#allocation5 + $0xf0] sm:$0xff]  ;;  %v311_v37 = vld [vmem:[#allocation5 + $0x128] sm:$0xff] }
  0x73   : > { %2025 = vmatprep.subr.bf16.mxu0 %v2024_v15  ;;  %v2034_v33 = vpack.c.bf16 %v301_v30, %v298_v29  ;;  %v314_v38 = vld [vmem:[#allocation5 + $0x140] sm:$0xff]  ;;  %v2038_v39 = vpack.c.bf16 %v307_v36, %v304_v35  ;;  %v313_v42 = vld [vmem:[#allocation5 + $0x138] sm:$0xff]  ;;  %v320_v44 = vld [vmem:[#allocation5 + $0x170] sm:$0xff]  ;;  %v334_v35 = vsub.s32 2, %v2700_v52 }
  0x74   : > { %v2040_v40 = vpack.c.bf16 %v314_v38, %v311_v37  ;;  %v310_v41 = vld [vmem:[#allocation5 + $0x120] sm:$0xff]  ;;  %v317_v43 = vld [vmem:[#allocation5 + $0x158] sm:$0xff]  ;;  %v316_v47 = vld [vmem:[#allocation5 + $0x150] sm:$0xff] }
  0x75   : > { %v2042_v45 = vpack.c.bf16 %v313_v42, %v310_v41  ;;  %v2044_v46 = vpack.c.bf16 %v320_v44, %v317_v43  ;;  %v319_v48 = vld [vmem:[#allocation5 + $0x168] sm:$0xff]  ;;  %v276_v53 = vld [vmem:[#allocation5 + $0x10] sm:$0xff]  ;;  %v282_v55 = vld [vmem:[#allocation5 + $0x40] sm:$0xff] }
  0x76   : > { %2027 = vmatpush1.bf16.msra.mxu0 %v2026_v20  ;;  %v2046_v49 = vpack.c.bf16 %v319_v48, %v316_v47  ;;  %v2697_v50 = vld [vmem:[%s2683_s14 + $0x8] sm:$0xff]  ;;  %v288_v59 = vld [vmem:[#allocation5 + $0x70] sm:$0xff]  ;;  %v2706_v62 = vld [vmem:[%s2873_s2] sm:$0x7]  ;;  %s2383_s14 = scalar_lea.vmem %s2822_s15, 256 }
  0x77   : > { %2029 = vmatprep.subr.bf16.mxu0 %v2028_v21  ;;  %v279_v54 = vld [vmem:[#allocation5 + $0x28] sm:$0xff]  ;;  %v285_v57 = vld [vmem:[#allocation5 + $0x58] sm:$0xff]  ;;  %v327_v2 = vrot.slane %v2706_v62, %v326_v61  ;;  %v300_v5 = vld [vmem:[#allocation5 + $0xd0] sm:$0xff]  ;;  %v331_v10 = vrot.slane %v2706_v62, %v330_v3  ;;  %v335_v36 = vrot.slane %v2706_v62, %v334_v35  ;;  %p2384_p11 = scmp.ne.s32.totalorder %s2822_s15, %s2383_s14  ;;  %p2391_p9 = scmp.lt.s32.totalorder %s2389_s26, %s2383_s14 }
  0x78   : > { %v2048_v56 = vpack.c.bf16 %v279_v54, %v276_v53  ;;  %v2052_v58 = vpack.c.bf16 %v285_v57, %v282_v55  ;;  %v291_v60 = vld [vmem:[#allocation5 + $0x88] sm:$0xff]  ;;  %v297_v1 = vld [vmem:[#allocation5 + $0xb8] sm:$0xff]  ;;  %v306_v12 = vld [vmem:[#allocation5 + $0x100] sm:$0xff] }
  0x79   : > { %v2056_v63 = vpack.c.bf16 %v291_v60, %v288_v59  ;;  %v303_v6 = vld [vmem:[#allocation5 + $0xe8] sm:$0xff]  ;;  %v309_v13 = vld [vmem:[#allocation5 + $0x118] sm:$0xff]  ;;  %vm2719_vm1 = vmpackc.low %vm491_vm0, %vm491_vm0  ;;  %p2385_p1 = pnand %p2384_p11, %p2892_p0  ;;  %p2392_p12 = por %p2391_p9, %p2390_p5 }
  0x7a   : > { %2031 = vmatpush1.bf16.msra.mxu0 %v2030_v27  ;;  %2049 = vmatprep.subr.bf16.mxu1 %v2048_v56  ;;  %v2064_v11 = vpack.c.bf16 %v303_v6, %v300_v5  ;;  %v2068_v18 = vpack.c.bf16 %v309_v13, %v306_v12  ;;  %v312_v20 = vld [vmem:[#allocation5 + $0x130] sm:$0xff]  ;;  %v315_v21 = vld [vmem:[#allocation5 + $0x148] sm:$0xff]  ;;  %v318_v25 = vld [vmem:[#allocation5 + $0x160] sm:$0xff] }
  0x7b   : > { %2033 = vmatprep.subr.bf16.mxu0 %v2032_v28  ;;  %2051 = vmatpush3.bf16.msra.mxu1 %v2048_v56  ;;  %v2072_v24 = vpack.c.bf16 %v315_v21, %v312_v20  ;;  %p2386_p3 = pneg %p2385_p1 }
  0x7c   : > { %2053 = vmatprep.subr.bf16.mxu1 %v2052_v58 }
  0x7d   : > { %p2393_p2 = pnand %p2392_p12, %p2386_p3 }
  0x7e   : > { %2035 = vmatpush1.bf16.msra.mxu0 %v2034_v33 }
  0x7f   : > { %2037 = vmatprep.subr.bf16.mxu0 %v2036_v34  ;;  %2055 = vmatpush3.bf16.msra.mxu1 %v2052_v58 }
  0x80   : > { %2057 = vmatprep.subr.bf16.mxu1 %v2056_v63 }
  0x82   : > { %2039 = vmatpush1.bf16.msra.mxu0 %v2038_v39 }
  0x83   : > { %2041 = vmatprep.subr.bf16.mxu0 %v2040_v40  ;;  %2059 = vmatpush3.bf16.msra.mxu1 %v2056_v63 }
  0x86   : > { %2043 = vmatpush1.bf16.msra.mxu0 %v2042_v45 }
  0x87   : > { %2045 = vmatprep.subr.bf16.mxu0 %v2044_v46 }
  0x8a   : > { %2047 = vmatpush1.bf16.msra.mxu0 %v2046_v49 }
  0x8d   : > { %404 = vmatmul.mubr.f32.vlgmr.msra.gmra.mrb[0].mxu0 %v272_v26  ;;  %v321_v26 = vld [vmem:[#allocation5 + $0x178] sm:$0xff] }
  0x8e   : > { %409 = vmatprep.mubr.f32.mxu0 %v2462_v0  ;;  %v294_v0 = vld [vmem:[#allocation5 + $0xa0] sm:$0xff]  ;;  %v2076_v27 = vpack.c.bf16 %v321_v26, %v318_v25 }
  0x8f   : > { %v2060_v4 = vpack.c.bf16 %v297_v1, %v294_v0  ;;  %v893_v26 = vld [vmem:[#allocation7 + $0x20] sm:$0xff] }
  0x91   : > { %410 = vmatmul.mubr.f32.gmra.mrb[2].mxu0 %v2697_v50  ;;  %2061 = vmatprep.subr.bf16.mxu1 %v2060_v4 }
  0x92   : > { %2063 = vmatpush3.bf16.msra.mxu1 %v2060_v4 }
  0x93   : > { %2065 = vmatprep.subr.bf16.mxu1 %v2064_v11 }
  0x96   : > { %2067 = vmatpush3.bf16.msra.mxu1 %v2064_v11 }
  0x97   : > { %2069 = vmatprep.subr.bf16.mxu1 %v2068_v18 }
  0x9a   : > { %2071 = vmatpush3.bf16.msra.mxu1 %v2068_v18 }
  0x9b   : > { %2073 = vmatprep.subr.bf16.mxu1 %v2072_v24 }
  0x9e   : > { %2075 = vmatpush3.bf16.msra.mxu1 %v2072_v24 }
  0x9f   : > { %2077 = vmatprep.subr.bf16.mxu1 %v2076_v27 }
  0xa2   : > { %2079 = vmatpush3.bf16.msra.mxu1 %v2076_v27  ;;  %v894_v27 = vld [vmem:[#allocation7 + $0x28] sm:$0xff] }
  0xa5   : > { %1914 = vmatmul.mubr.f32.vlgmr.msra.gmra.mrb[0].mxu1 %v2697_v50 }
 0x160   : > { %v405_v7 = vpop.f32.mrb[0].mxu0 }
 0x161   : > { %v2710_v8 = vadd.f32 %v405_v7, %v327_v2  ;;  %v407_v9 = vpop.f32.mrb[1].mxu0 }
 0x162   : > { %v408_v16 = vadd.f32 %v407_v9, %v331_v10 }
 0x163   : > { %689 = vrot.lane.b32.xlu1 %v2710_v8, %s2463_s12  ;;  %1920 = vmatprep.mubr.msk.f32.mxu0 %vm491_vm0, %v2710_v8 }
 0x164   : > { %v411_v14 = vpop.f32.mrb[2].mxu0 }
 0x165   : > { %v413_v15 = vpop.f32.mrb[3].mxu0  ;;  %v2729_v28 = vadd.f32 %v411_v14, %v327_v2 }
 0x166   : > { %v414_v17 = vadd.f32 %v413_v15, %v331_v10 }
 0x168   : > { %v2080_v22 = vpack.c.bf16 %v414_v17, %v408_v16  ;;  %v2723_v23 = vpack.i.bf16 %v414_v17, %v408_v16 }
 0x16a   : > { %2082 = vmatprep.subr.msk.bf16.mxu0 %vm2719_vm1, %v2080_v22 }
 0x16b   : > { %2085 = vmatpush3.bf16.xpose.msk.msra.mxu0 %vm2719_vm1, %v2080_v22 }
 0x172   : > { %1921 = vmatmul.mubr.msk.f32.vlgmr.msra.gmra.mrb[4].mxu0 %vm491_vm0, %v2729_v28 }
 0x178   : > { %v1915_v37 = vpop.f32.mrb[0].mxu1 }
 0x179   : > { %v482_v38 = vpop.f32.mrb[1].mxu1  ;;  %v488_v39 = vadd.f32 %v1915_v37, %v335_v36 }
 0x17a   : > { %v483_v40 = vadd.f32 %v482_v38, %v335_v36 }
 0x17c   : > { %v2086_v41 = vpack.c.bf16 %v488_v39, %v483_v40  ;;  %v2758_v9 = vpack.i.bf16 %v488_v39, %v483_v40 }
 0x17e   : > { %2087 = vmatprep.subr.bf16.mxu1 %v2086_v41 }
 0x17f   : > { %2089 = vmatpush3.bf16.msra.mxu1 %v2086_v41 }
 0x1d5   : > { %v690_v56 = vpop.permute.xlu1 %689 }
 0x245   : > { %v1922_v29 = vpop.f32.mrb[4].mxu0 }
 0x246   : > { %v570_v30 = vpop.f32.mrb[5].mxu0  ;;  %v580_v32 = vmul.f32 0.17677669, %v1922_v29  ;;  %v895_v29 = vld [vmem:[#allocation7 + $0x30] sm:$0xff] }
 0x247   : > { %v579_v31 = vmul.f32 0.17677669, %v570_v30  ;;  %v2100_v30 = vpack.c.bf16 %v894_v27, %v893_v26 }
 0x248   : > { %v585_v34 = vsel %vm581_vm2, %v580_v32, -inf }
 0x249   : > { %v582_v33 = vsel %vm581_vm2, %v579_v31, -inf  ;;  %2101 = vmatprep.subr.bf16.mxu0 %v2100_v30 }
 0x24a   : > { %583 = vmax.xlane.f32.xlu0 %v582_v33  ;;  %2103 = vmatpush3.bf16.msra.mxu0 %v2100_v30 }
 0x24e   : > { %586 = vmax.xlane.f32.xlu0 %v585_v34 }
 0x264   : > { %2236 = vrot.lane.b32.xlu0 %v2723_v23, %s2463_s12 }
 0x2d7   : > { %v584_v42 = vpop.xlane.xlu0 %583 }
 0x2d8   : > { %v588_v43 = vsub.f32 %v579_v31, %v584_v42  ;;  %v896_v31 = vld [vmem:[#allocation7 + $0x38] sm:$0xff] }
 0x2da   : > { %v590_v46 = vmul.f32 1.442695, %v588_v43 }
 0x2db   : > { %v587_v44 = vpop.xlane.xlu0 %586 }
 0x2dc   : > { %v589_v45 = vsub.f32 %v580_v32, %v587_v44  ;;  %v2104_v32 = vpack.c.bf16 %v896_v31, %v895_v29 }
 0x2de   : > { %v592_v47 = vmul.f32 1.442695, %v589_v45  ;;  %2105 = vmatprep.subr.bf16.mxu0 %v2104_v32  ;;  %v685_v45 = vld [vmem:[#allocation7] sm:$0xff] }
 0x2df   : > { %v2237_v48 = vpop.permute.xlu0 %2236  ;;  %2107 = vmatpush3.bf16.msra.mxu0 %v2104_v32 }
 0x2e0   : > { %2265 = vpow2.f32 %v592_v47  ;;  %v2239_v49 = vunpack.i.h.bf16 %v2237_v48  ;;  %v2238_v50 = vunpack.i.l.bf16 %v2237_v48  ;;  %v687_v48 = vld [vmem:[#allocation7 + $0x10] sm:$0xff] }
 0x2e1   : > { %2267 = vpow2.f32 %v590_v46  ;;  %v686_v46 = vld [vmem:[#allocation7 + $0x8] sm:$0xff] }
 0x2e2   : > { %v2090_v51 = vpack.c.bf16 %v2239_v49, %v2238_v50  ;;  %v2108_v47 = vpack.c.bf16 %v686_v46, %v685_v45  ;;  %v688_v49 = vld [vmem:[#allocation7 + $0x18] sm:$0xff] }
 0x2e4   : > { %2092 = vmatprep.subr.msk.bf16.mxu1 %vm2719_vm1, %v2090_v51  ;;  %2109 = vmatprep.subr.bf16.mxu0 %v2108_v47 }
 0x2ea   : > { %v2266_v52 = vpop.eup %2265 }
 0x2eb   : > { %v597_v53 = vsel %vm581_vm2, %v2266_v52, 0.0  ;;  %v2268_v54 = vpop.eup %2267 }
 0x2ec   : > { %598 = vadd.xlane.f32.xlu1 %v597_v53  ;;  %v594_v55 = vsel %vm581_vm2, %v2268_v54, 0.0 }
 0x2f0   : > { %595 = vadd.xlane.f32.xlu1 %v594_v55 }
 0x301   : > { %691 = vrot.lane.b32.xlu1 %v2729_v28, %s2463_s12 }
 0x379   : > { %v599_v57 = vpop.xlane.xlu1 %598 }
 0x37a   : > { %2269 = vrcp.f32 %v599_v57 }
 0x37d   : > { %v596_v58 = vpop.xlane.xlu1 %595 }
 0x37e   : > { %2271 = vrcp.f32 %v596_v58 }
 0x381   : > { %v692_v63 = vpop.permute.xlu1 %691 }
 0x384   : > { %v2270_v59 = vpop.eup %2269 }
 0x385   : > { %v603_v62 = vmul.f32 %v2270_v59, %v2266_v52  ;;  %v2112_v52 = vpack.c.bf16 %v688_v49, %v687_v48  ;;  %v1550_v49 = vld [vmem:[#allocation7 + $0x60] sm:$0xff] }
 0x388   : > { %v2272_v60 = vpop.eup %2271 }
 0x389   : > { %v602_v61 = vmul.f32 %v2272_v60, %v2268_v54 }
 0x38b   : > { %1927 = vmatprep.mubr.msk.f32.mxu1 %vm581_vm2, %v602_v61 }
 0x38c   : > { %1928 = vmatmul.mubr.msk.f32.vlgmr.msra.gmra.mrb[2].mxu1 %vm581_vm2, %v603_v62 }
 0x38d   : > { %2095 = vmatpush3.bf16.xpose.msk.msra.mxu1 %vm2719_vm1, %v2090_v51  ;;  %1934 = vmatprep.mubr.msk.f32.mxu1 %vm491_vm0, %v690_v56 }
 0x394   : > { %1935 = vmatmul.mubr.msk.f32.vlgmr.msra.gmra.mrb[4].mxu1 %vm491_vm0, %v692_v63 }
 0x45f   : > { %v2752_v0 = vpop.f32.mrb[2].mxu1 }
 0x460   : > { %v2754_v1 = vpop.f32.mrb[3].mxu1 }
 0x467   : > { %v1936_v2 = vpop.f32.mrb[4].mxu1 }
 0x468   : > { %v781_v3 = vmul.f32 0.17677669, %v1936_v2  ;;  %v771_v4 = vpop.f32.mrb[5].mxu1 }
 0x469   : > { %v780_v5 = vmul.f32 0.17677669, %v771_v4 }
 0x46a   : > { %v785_v6 = vsel %vm581_vm2, %v781_v3, -inf }
 0x46b   : > { %786 = vmax.xlane.f32.xlu0 %v785_v6  ;;  %v782_v7 = vsel %vm581_vm2, %v780_v5, -inf }
 0x46c   : > { %783 = vmax.xlane.f32.xlu1 %v782_v7  ;;  %v1261_v7 = vld [vmem:[#allocation7 + $0x40] sm:$0xff] }
 0x47d   : > { %2241 = vrot.lane.b32.xlu1 %v2758_v9, %s2463_s12 }
 0x481   : > { %1059 = vrot.lane.b32.xlu1 %v2710_v8, %s2464_s13 }
 0x485   : > { %1061 = vrot.lane.b32.xlu1 %v2729_v28, %s2464_s13 }
 0x4f8   : > { %v787_v10 = vpop.xlane.xlu0 %786 }
 0x4f9   : > { %v789_v11 = vsub.f32 %v781_v3, %v787_v10  ;;  %v784_v12 = vpop.xlane.xlu1 %783  ;;  %v1262_v10 = vld [vmem:[#allocation7 + $0x48] sm:$0xff] }
 0x4fa   : > { %v788_v13 = vsub.f32 %v780_v5, %v784_v12  ;;  %v2126_v12 = vpack.c.bf16 %v1262_v10, %v1261_v7 }
 0x4fb   : > { %v792_v14 = vmul.f32 1.442695, %v789_v11  ;;  %v1263_v11 = vld [vmem:[#allocation7 + $0x50] sm:$0xff] }
 0x4fc   : > { %v790_v15 = vmul.f32 1.442695, %v788_v13  ;;  %v1264_v13 = vld [vmem:[#allocation7 + $0x58] sm:$0xff] }
 0x4fd   : > { %2273 = vpow2.f32 %v792_v14  ;;  %v2242_v16 = vpop.permute.xlu1 %2241  ;;  %v2130_v14 = vpack.c.bf16 %v1264_v13, %v1263_v11 }
 0x4fe   : > { %v2244_v17 = vunpack.i.h.bf16 %v2242_v16  ;;  %v2243_v18 = vunpack.i.l.bf16 %v2242_v16  ;;  %2275 = vpow2.f32 %v790_v15 }
 0x500   : > { %v2096_v20 = vpack.c.bf16 %v2244_v17, %v2243_v18 }
 0x501   : > { %v1060_v43 = vpop.permute.xlu1 %1059 }
 0x502   : > { %2097 = vmatprep.subr.bf16.mxu1 %v2096_v20 }
 0x503   : > { %2099 = vmatpush3.bf16.msra.mxu1 %v2096_v20 }
 0x505   : > { %v1062_v44 = vpop.permute.xlu1 %1061 }
 0x507   : > { %v2274_v21 = vpop.eup %2273 }
 0x508   : > { %v797_v22 = vsel %vm581_vm2, %v2274_v21, 0.0  ;;  %v2276_v24 = vpop.eup %2275 }
 0x509   : > { %798 = vadd.xlane.f32.xlu0 %v797_v22  ;;  %v794_v25 = vsel %vm581_vm2, %v2276_v24, 0.0 }
 0x50d   : > { %795 = vadd.xlane.f32.xlu0 %v794_v25 }
 0x523   : > { %2246 = vrot.lane.b32.xlu0 %v2723_v23, %s2464_s13 }
 0x596   : > { %v799_v33 = vpop.xlane.xlu0 %798 }
 0x597   : > { %2277 = vrcp.f32 %v799_v33 }
 0x59a   : > { %v796_v34 = vpop.xlane.xlu0 %795 }
 0x59b   : > { %2279 = vrcp.f32 %v796_v34 }
 0x59e   : > { %v2247_v35 = vpop.permute.xlu0 %2246 }
 0x59f   : > { %v2249_v36 = vunpack.i.h.bf16 %v2247_v35  ;;  %v2248_v37 = vunpack.i.l.bf16 %v2247_v35 }
 0x5a1   : > { %v2116_v38 = vpack.c.bf16 %v2249_v36, %v2248_v37  ;;  %v2278_v39 = vpop.eup %2277 }
 0x5a2   : > { %v803_v42 = vmul.f32 %v2278_v39, %v2274_v21 }
 0x5a3   : > { %2118 = vmatprep.subr.msk.bf16.mxu1 %vm2719_vm1, %v2116_v38 }
 0x5a5   : > { %v2280_v40 = vpop.eup %2279 }
 0x5a6   : > { %v802_v41 = vmul.f32 %v2280_v40, %v2276_v24 }
 0x5a8   : > { %1941 = vmatprep.mubr.msk.f32.mxu1 %vm581_vm2, %v802_v41 }
 0x5a9   : > { %1942 = vmatmul.mubr.msk.f32.vlgmr.msra.gmra.mrb[6].mxu1 %vm581_vm2, %v803_v42 }
 0x5aa   : > { %2121 = vmatpush3.bf16.xpose.msk.msra.mxu1 %vm2719_vm1, %v2116_v38  ;;  %1970 = vmatprep.mubr.msk.f32.mxu1 %vm491_vm0, %v1060_v43 }
 0x5b1   : > { %1971 = vmatmul.mubr.msk.f32.vlgmr.msra.gmra.mrb[8].mxu1 %vm491_vm0, %v1062_v44 }
 0x67c   : > { %v1943_v50 = vpop.f32.mrb[6].mxu1 }
 0x67d   : > { %v884_v51 = vpop.f32.mrb[7].mxu1 }
 0x67e   : > { %1952 = vmatprep.mubr.msk.f32.mxu0 %vm491_vm0, %v884_v51  ;;  %v1552_v51 = vld [vmem:[#allocation7 + $0x70] sm:$0xff] }
 0x67f   : > { %1953 = vmatmul.mubr.msk.f32.vlgmr.msra.gmra.mrb[6].mxu0 %vm491_vm0, %v1943_v50  ;;  %v1551_v50 = vld [vmem:[#allocation7 + $0x68] sm:$0xff] }
 0x680   : > { %2111 = vmatpush3.bf16.msra.mxu0 %v2108_v47  ;;  %1963 = vmatprep.mubr.msk.f32.mxu0 %vm491_vm0, %v2754_v1 }
 0x681   : > { %2113 = vmatprep.subr.bf16.mxu0 %v2112_v52 }
 0x684   : > { %v1972_v53 = vpop.f32.mrb[8].mxu1  ;;  %2115 = vmatpush3.bf16.msra.mxu0 %v2112_v52  ;;  %v2144_v52 = vpack.c.bf16 %v1551_v50, %v1550_v49 }
 0x685   : > { %v1151_v54 = vmul.f32 0.17677669, %v1972_v53  ;;  %v1141_v55 = vpop.f32.mrb[9].mxu1  ;;  %2127 = vmatprep.subr.bf16.mxu0 %v2126_v12  ;;  %v1553_v53 = vld [vmem:[#allocation7 + $0x78] sm:$0xff] }
 0x686   : > { %v1150_v56 = vmul.f32 0.17677669, %v1141_v55 }
 0x687   : > { %v1155_v57 = vsel %vm581_vm2, %v1151_v54, -inf  ;;  %1964 = vmatmul.mubr.msk.f32.vlgmr.msra.gmra.mrb[6].mxu0 %vm491_vm0, %v2752_v0 }
 0x688   : > { %1156 = vmax.xlane.f32.xlu0 %v1155_v57  ;;  %v1152_v58 = vsel %vm581_vm2, %v1150_v56, -inf  ;;  %2129 = vmatpush3.bf16.msra.mxu0 %v2126_v12 }
 0x689   : > { %1153 = vmax.xlane.f32.xlu1 %v1152_v58  ;;  %2131 = vmatprep.subr.bf16.mxu0 %v2130_v14 }
 0x68c   : > { %2133 = vmatpush3.bf16.msra.mxu0 %v2130_v14 }
 0x68d   : > { %2145 = vmatprep.subr.bf16.mxu0 %v2144_v52 }
 0x69a   : > { %2251 = vrot.lane.b32.xlu1 %v2758_v9, %s2464_s13 }
 0x69e   : > { %1348 = vrot.lane.b32.xlu1 %v2710_v8, %s2465_s10 }
 0x6a2   : > { %1350 = vrot.lane.b32.xlu1 %v2729_v28, %s2465_s10 }
 0x715   : > { %v1157_v59 = vpop.xlane.xlu0 %1156 }
 0x716   : > { %v1159_v60 = vsub.f32 %v1151_v54, %v1157_v59  ;;  %v1154_v61 = vpop.xlane.xlu1 %1153  ;;  %v2148_v54 = vpack.c.bf16 %v1553_v53, %v1552_v51 }
 0x717   : > { %v1158_v62 = vsub.f32 %v1150_v56, %v1154_v61 }
 0x718   : > { %v1162_v63 = vmul.f32 1.442695, %v1159_v60 }
 0x719   : > { %v1160_v0 = vmul.f32 1.442695, %v1158_v62 }
 0x71a   : > { %2281 = vpow2.f32 %v1162_v63  ;;  %v2252_v1 = vpop.permute.xlu1 %2251  ;;  %v1799_v63 = vld [vmem:[%s2875_s4] ss:$0 sm:$0xff] }
 0x71b   : > { %v2254_v2 = vunpack.i.h.bf16 %v2252_v1  ;;  %v2253_v3 = vunpack.i.l.bf16 %v2252_v1  ;;  %2283 = vpow2.f32 %v1160_v0 }
 0x71d   : > { %v2122_v4 = vpack.c.bf16 %v2254_v2, %v2253_v3 }
 0x71e   : > { %v1349_v26 = vpop.permute.xlu1 %1348 }
 0x71f   : > { %2123 = vmatprep.subr.bf16.mxu1 %v2122_v4 }
 0x720   : > { %2125 = vmatpush3.bf16.msra.mxu1 %v2122_v4 }
 0x722   : > { %v1351_v27 = vpop.permute.xlu1 %1350 }
 0x724   : > { %v2282_v5 = vpop.eup %2281 }
 0x725   : > { %v1167_v8 = vsel %vm581_vm2, %v2282_v5, 0.0  ;;  %v2284_v6 = vpop.eup %2283 }
 0x726   : > { %1168 = vadd.xlane.f32.xlu0 %v1167_v8  ;;  %v1164_v28 = vsel %vm581_vm2, %v2284_v6, 0.0 }
 0x72a   : > { %1165 = vadd.xlane.f32.xlu0 %v1164_v28 }
 0x740   : > { %2256 = vrot.lane.b32.xlu0 %v2723_v23, %s2465_s10 }
 0x7b3   : > { %v1169_v15 = vpop.xlane.xlu0 %1168 }
 0x7b4   : > { %2285 = vrcp.f32 %v1169_v15 }
 0x7b7   : > { %v1166_v16 = vpop.xlane.xlu0 %1165 }
 0x7b8   : > { %2287 = vrcp.f32 %v1166_v16 }
 0x7bb   : > { %v2257_v17 = vpop.permute.xlu0 %2256 }
 0x7bc   : > { %v2259_v18 = vunpack.i.h.bf16 %v2257_v17  ;;  %v2258_v20 = vunpack.i.l.bf16 %v2257_v17 }
 0x7be   : > { %v2134_v21 = vpack.c.bf16 %v2259_v18, %v2258_v20  ;;  %v2286_v23 = vpop.eup %2285 }
 0x7bf   : > { %v1173_v25 = vmul.f32 %v2286_v23, %v2282_v5 }
 0x7c0   : > { %2136 = vmatprep.subr.msk.bf16.mxu1 %vm2719_vm1, %v2134_v21 }
 0x7c2   : > { %v2288_v22 = vpop.eup %2287 }
 0x7c3   : > { %v1172_v24 = vmul.f32 %v2288_v22, %v2284_v6 }
 0x7c5   : > { %1977 = vmatprep.mubr.msk.f32.mxu1 %vm581_vm2, %v1172_v24 }
 0x7c6   : > { %1978 = vmatmul.mubr.msk.f32.vlgmr.msra.gmra.mrb[10].mxu1 %vm581_vm2, %v1173_v25 }
 0x7c7   : > { %2139 = vmatpush3.bf16.xpose.msk.msra.mxu1 %vm2719_vm1, %v2134_v21  ;;  %1995 = vmatprep.mubr.msk.f32.mxu1 %vm491_vm0, %v1349_v26 }
 0x7ce   : > { %1996 = vmatmul.mubr.msk.f32.vlgmr.msra.gmra.mrb[12].mxu1 %vm491_vm0, %v1351_v27 }
 0x899   : > { %v1979_v29 = vpop.f32.mrb[10].mxu1 }
 0x89a   : > { %v1252_v30 = vpop.f32.mrb[11].mxu1 }
 0x89b   : > { %1988 = vmatprep.mubr.msk.f32.mxu0 %vm491_vm0, %v1252_v30 }
 0x89c   : > { %1989 = vmatmul.mubr.msk.f32.vlgmr.msra.gmra.mrb[6].mxu0 %vm491_vm0, %v1979_v29 }
 0x89d   : > { %2147 = vmatpush3.bf16.msra.mxu0 %v2144_v52 }
 0x89e   : > { %2149 = vmatprep.subr.bf16.mxu0 %v2148_v54 }
 0x8a1   : > { %v1997_v31 = vpop.f32.mrb[12].mxu1  ;;  %2151 = vmatpush3.bf16.msra.mxu0 %v2148_v54 }
 0x8a2   : > { %v1440_v32 = vmul.f32 0.17677669, %v1997_v31  ;;  %v1430_v33 = vpop.f32.mrb[13].mxu1 }
 0x8a3   : > { %v1439_v34 = vmul.f32 0.17677669, %v1430_v33 }
 0x8a4   : > { %v1444_v35 = vsel %vm581_vm2, %v1440_v32, -inf }
 0x8a5   : > { %1445 = vmax.xlane.f32.xlu0 %v1444_v35  ;;  %v1441_v19 = vsel %vm581_vm2, %v1439_v34, -inf }
 0x8a6   : > { %1442 = vmax.xlane.f32.xlu1 %v1441_v19 }
 0x8b7   : > { %2261 = vrot.lane.b32.xlu1 %v2758_v9, %s2465_s10 }
 0x932   : > { %v1446_v36 = vpop.xlane.xlu0 %1445 }
 0x933   : > { %v1448_v37 = vsub.f32 %v1440_v32, %v1446_v36  ;;  %v1443_v38 = vpop.xlane.xlu1 %1442 }
 0x934   : > { %v1447_v39 = vsub.f32 %v1439_v34, %v1443_v38 }
 0x935   : > { %v1451_v40 = vmul.f32 1.442695, %v1448_v37 }
 0x936   : > { %v1449_v41 = vmul.f32 1.442695, %v1447_v39 }
 0x937   : > { %v2262_v42 = vpop.permute.xlu1 %2261 }
 0x938   : > { %2289 = vpow2.f32 %v1449_v41  ;;  %v2264_v43 = vunpack.i.h.bf16 %v2262_v42  ;;  %v2263_v44 = vunpack.i.l.bf16 %v2262_v42 }
 0x939   : > { %2291 = vpow2.f32 %v1451_v40 }
 0x93a   : > { %v2140_v45 = vpack.c.bf16 %v2264_v43, %v2263_v44 }
 0x93c   : > { %2141 = vmatprep.subr.bf16.mxu1 %v2140_v45 }
 0x93d   : > { %2143 = vmatpush3.bf16.msra.mxu1 %v2140_v45 }
 0x942   : > { %v2290_v46 = vpop.eup %2289 }
 0x943   : > { %v1453_v47 = vsel %vm581_vm2, %v2290_v46, 0.0  ;;  %v2292_v48 = vpop.eup %2291 }
 0x944   : > { %1454 = vadd.xlane.f32.xlu0 %v1453_v47  ;;  %v1456_v9 = vsel %vm581_vm2, %v2292_v48, 0.0 }
 0x948   : > { %1457 = vadd.xlane.f32.xlu0 %v1456_v9 }
 0x9d1   : > { %v1455_v55 = vpop.xlane.xlu0 %1454 }
 0x9d2   : > { %2293 = vrcp.f32 %v1455_v55 }
 0x9d5   : > { %v1458_v56 = vpop.xlane.xlu0 %1457 }
 0x9d6   : > { %2295 = vrcp.f32 %v1458_v56 }
 0x9dc   : > { %v2294_v57 = vpop.eup %2293 }
 0x9dd   : > { %v1461_v58 = vmul.f32 %v2294_v57, %v2290_v46 }
 0x9df   : > { %2002 = vmatprep.mubr.msk.f32.mxu1 %vm581_vm2, %v1461_v58 }
 0x9e0   : > { %v2296_v59 = vpop.eup %2295 }
 0x9e1   : > { %v1462_v60 = vmul.f32 %v2296_v59, %v2292_v48 }
 0x9e3   : > { %2003 = vmatmul.mubr.msk.f32.vlgmr.msra.gmra.mrb[14].mxu1 %vm581_vm2, %v1462_v60 }
 0xab6   : > { %v2004_v61 = vpop.f32.mrb[14].mxu1 }
 0xab7   : > { %v1541_v62 = vpop.f32.mrb[15].mxu1 }
 0xab8   : > { %2013 = vmatprep.mubr.msk.f32.mxu0 %vm491_vm0, %v1541_v62 }
 0xab9   : > { %2014 = vmatmul.mubr.msk.f32.vlgmr.msra.gmra.mrb[6].mxu0 %vm491_vm0, %v2004_v61 }
 0xb8c   : > { %v2015_v0 = vpop.f32.mrb[6].mxu0 }
 0xb8d   : > { %v1645_v1 = vadd.f32 %v2015_v0, %v1799_v63  ;;  %v1626_v2 = vpop.f32.mrb[7].mxu0 }
 0xb8e   : > { %v1644_v3 = vadd.f32 %v1799_v63, %v1626_v2 }
 0xb8f   : > { %1647 = vst [vmem:[%s271_s28 + $0x8] sm:$0xff] %v1645_v1 }
 0xb90   : > { %1646 = vst [vmem:[%s271_s28] sm:$0xff] %v1644_v3 }
 0xb91   : > { %2396 = shalt.err (!%p2393_p2)
}
 0xb92   : > { %s2397_s12 = scalar_lea.hbm %s2827_s8, 256  ;;  %s2401_s28 = scalar_lea.hbm %s2876_s5, 512 }
 0xb93   : > { %p2398_p13 = scmp.ne.s32.totalorder %s2827_s8, %s2397_s12  ;;  %p2402_p4 = scmp.lt.u32.totalorder %s2827_s8, %s2876_s5 }
 0xb94   : > { %p2403_p7 = scmp.lt.u32.totalorder %s2401_s28, %s2397_s12  ;;  %p2405_p11 = scmp.lt.u32.totalorder %s2397_s12, %s2827_s8 }
 0xb95   : > { %p2399_p6 = pnand %p2398_p13, %p2892_p0 }
 0xb96   : > { %p2404_p8 = por %p2403_p7, %p2402_p4 }
 0xb97   : > { %p2400_p10 = pneg %p2399_p6 }
 0xb98   : > { %p2406_p1 = por %p2405_p11, %p2404_p8 }
 0xb9a   : > { %p2407_p3 = pnand %p2406_p1, %p2400_p10 }
 0xb9c   : > { %2410 = shalt.err (!%p2407_p3)
}
 0xb9d   : > { %s2467_s11 = smov 128   ;;  %s2468_s23 = smov 8  }
 0xb9e   : > { %2168 = dma.vmem_to_hbm [thread:$0]  (%p2892_p0), %s2822_s15, 256, %s2827_s8, %s1649_s6, %s2467_s11, %s2467_s11, %s2468_s23  }
 0xb9f PF: > { %s1677_s7 = sand.u32 1, %s2441_s18   ;;  %p2893_p5 = scmp.ne.s32.totalorder %s2881_s25, 0 }
 0xba0   : > { %p2894_p9 = scmp.ge.s32.totalorder %s2453_s21, 2  ;;  %s1678_s14 = scalar_lea.sflag [#allocation4], %s1677_s7 }
 0xba2   : > { %p2182_p12 = pnand %p2894_p9, %p2893_p5 }
 0xba4   : > { %2436 = dma.done.wait (!%p2182_p12), %s1678_s14, 256  }
 0xba5   : > { %2438 = vsyncadd (!%p2182_p12), %s1678_s14, 4294967040  ;;  %p19_p2 = scmp.ge.s32.totalorder %s2612_s16, 4   ;;  %s2895_s18 = smov %s2445_s19 }
 0xba6   : > { %s2896_s19 = smov %s2449_s20  ;;  %s2897_s20 = smov %s2621_s27 }
 0xba7   : > { %s2898_s21 = smov %s2612_s16  ;;  %21 = sbr.rel (!%p19_p2) target bundleno = 6 (0x6), region = 93 }
 0xbae   :  { %1683 = vsyncpa [#allocation3], 1 }
 0xbaf   :  { %1685 = vsyncpa [#allocation3 + $0x1], 1 }
 0xbb0   :  { %1686 = vsyncpa [#allocation6], 1 }
 0xbb1   :  { %1687 = vsyncpa [#allocation4], 1 }
 0xbb2   :  { %1689 = vsyncpa [#allocation4 + $0x1], 1 }

</bundles_post_ra>
